<compile_context>
chip_gen: v5e
topology: v5e:2x2
jax: 0.10.0
libtpu: 0.0.40
codegen_flags: <defaults>
</compile_context>

<pallas_src>
import functools
import math
import numpy as np

import jax
import jax.numpy as jnp
from jax.experimental import pallas as pl
from jax.experimental.pallas import tpu as pltpu

_LANES = 128  # all kernel in/out slabs are 128-wide (lane-dense loads/stores)


def _round_up(v: int, m: int) -> int:
    return (v + m - 1) // m * m


def _choose_tiles(n: int):
    """Return (TM row-strip, TK reduction-strip, Np padded node count)."""
    if n <= 1024:
        t = _round_up(max(n, 1), _LANES)
        return t, t, t          # single-tile grid for small graphs
    # ~2 MiB bf16 A block x 2 buffers + slabs + acc  ==> < 8 MiB VMEM total,
    # comfortably under default scoped VMEM limits on v5e/v6e/v7x.
    return 1024, 1024, _round_up(n, 1024)


# ----------------------------------------------------------------------------
# Prep kernel: per-node raw score  h_j = elu(w . x_j + b), packed into a
# lane-dense bf16 slab  rhs[j] = [elu(h_j), 1, 0, ..., 0].  The "1" column
# lets the big adjacency matmul also produce the node degree.
#   xslab:  [TM, 128] f32, cols [0,C) = x, col C = 1
#   wslab:  [128, 128] f32, col 0 = [w; b; 0...], col 1 = e_C (picks the ones)
# ----------------------------------------------------------------------------
def _prep_kernel(xslab_ref, wslab_ref, rhs_ref):
    h = jnp.dot(xslab_ref[...], wslab_ref[...],
                preferred_element_type=jnp.float32)        # [TM, 128]
    col0 = h[:, 0:1]                                       # w.x + b
    elu0 = jnp.where(col0 > 0.0, col0,
                     jnp.exp(jnp.minimum(col0, 0.0)) - 1.0)
    lane = jax.lax.broadcasted_iota(jnp.int32, h.shape, 1)
    slab = jnp.where(lane == 0, elu0, h)                   # col1 stays exactly 1
    rhs_ref[...] = slab.astype(rhs_ref.dtype)


# ----------------------------------------------------------------------------
# Pass 1 (LSSMP): per destination-row strip accumulate A @ rhs over K strips.
#   acc[:, 0] = sum_j A_ij * elu(h_j),  acc[:, 1] = deg_i
# At the last K step: scores = sigmoid(acc0 / deg), and emit the gated-feature
# slab  [scores_i * x_i | 1 | 0 ...]  (bf16) consumed by pass 2.
# ----------------------------------------------------------------------------
def _scores_kernel(a_ref, rhs_ref, xslab_ref, gated_ref, scores_ref, acc_ref, *, C):
    k = pl.program_id(1)

    @pl.when(k == 0)
    def _():
        acc_ref[...] = jnp.zeros_like(acc_ref)

    acc_ref[...] += jnp.dot(a_ref[...], rhs_ref[...],
                            preferred_element_type=jnp.float32)

    @pl.when(k == pl.num_programs(1) - 1)
    def _():
        acc = acc_ref[...]                                  # [TM, 128] f32
        msum = acc[:, 0:1]                                  # neighbor sum of elu(h)
        deg = acc[:, 1:2]                                   # node degree
        inv_deg = pl.reciprocal(jnp.maximum(deg, 1.0), approx=True)  # EUP
        scores = jax.nn.sigmoid(msum * inv_deg)             # [TM, 1]
        scores_ref[...] = jnp.broadcast_to(scores, scores_ref.shape)

        # gated slab: lanes [0,C) = scores_i * x_i, lane C stays 1 (degree col).
        lane = jax.lax.broadcasted_iota(jnp.int32, gated_ref.shape, 1)
        scale = jnp.where(lane == C, 1.0, scores)           # [TM, 128]
        gated_ref[...] = (xslab_ref[...] * scale).astype(gated_ref.dtype)


# ----------------------------------------------------------------------------
# Pass 2 (LSCMP): x_out = D^-1 * A @ (scores * x), degree recovered from the
# ones column of the gated slab (column C).
# ----------------------------------------------------------------------------
def _aggregate_kernel(a_ref, g_ref, out_ref, acc_ref, *, C):
    k = pl.program_id(1)

    @pl.when(k == 0)
    def _():
        acc_ref[...] = jnp.zeros_like(acc_ref)

    acc_ref[...] += jnp.dot(a_ref[...], g_ref[...],
                            preferred_element_type=jnp.float32)

    @pl.when(k == pl.num_programs(1) - 1)
    def _():
        acc = acc_ref[...]                                  # [TM, 128] f32
        deg = acc[:, C:C + 1]                               # from the ones column
        inv_deg = pl.reciprocal(jnp.maximum(deg, 1.0), approx=True)
        out_ref[...] = acc * inv_deg                        # lane-dense f32 store


# ----------------------------------------------------------------------------
# Wrapper: three pallas_calls on padded, tile-aligned arrays.
# ----------------------------------------------------------------------------
def lspool_core(x_pad, w, b, a_pad):
    """x_pad: [Np, C] f32, w: [C, 1] f32, b: scalar f32, a_pad: [Np, Np] bf16.
    Returns (scores [Np] f32, x_out [Np, C] f32)."""
    Np, C = x_pad.shape
    assert C + 1 <= _LANES, "in_channels must be < 128 for the packed slab"
    TM, TK, Np2 = _choose_tiles(Np)
    assert Np2 == Np and Np % TM == 0 and Np % TK == 0

    # Lane-dense node slab: cols [0,C) = x, col C = 1 (degree / ones column).
    xslab = jnp.zeros((Np, _LANES), jnp.float32)
    xslab = xslab.at[:, :C].set(x_pad)
    xslab = xslab.at[:, C].set(1.0)
    # Augmented weight slab: col 0 = [w; b; 0...], col 1 = e_C (ones selector).
    wslab = jnp.zeros((_LANES, _LANES), jnp.float32)
    wslab = wslab.at[:C, 0].set(w[:, 0])
    wslab = wslab.at[C, 0].set(b)
    wslab = wslab.at[C, 1].set(1.0)

    grid_mm = (Np // TM, Np // TK)
    mm_params = pltpu.CompilerParams(
        dimension_semantics=("parallel", "arbitrary"),   # row strips -> 2 TCs on v7x
    )

    # --- prep: rhs slab [Np, 128] bf16 = [elu(Wx+b) | 1 | 0 ...] --------------
    rhs = pl.pallas_call(
        _prep_kernel,
        out_shape=jax.ShapeDtypeStruct((Np, _LANES), jnp.bfloat16),
        grid=(Np // TM,),
        in_specs=[
            pl.BlockSpec((TM, _LANES), lambda i: (i, 0)),
            pl.BlockSpec((_LANES, _LANES), lambda i: (0, 0)),
        ],
        out_specs=pl.BlockSpec((TM, _LANES), lambda i: (i, 0)),
        compiler_params=pltpu.CompilerParams(dimension_semantics=("parallel",)),
    )(xslab, wslab)

    # --- pass 1: scores + gated-feature slab ---------------------------------
    gated, scores_pad = pl.pallas_call(
        functools.partial(_scores_kernel, C=C),
        out_shape=(
            jax.ShapeDtypeStruct((Np, _LANES), jnp.bfloat16),   # gated slab
            jax.ShapeDtypeStruct((Np, _LANES), jnp.float32),    # scores (bcast)
        ),
        grid=grid_mm,
        in_specs=[
            pl.BlockSpec((TM, TK), lambda i, k: (i, k)),        # A strip (bf16)
            pl.BlockSpec((TK, _LANES), lambda i, k: (k, 0)),    # rhs slab
            pl.BlockSpec((TM, _LANES), lambda i, k: (i, 0)),    # x slab (dst rows)
        ],
        out_specs=(
            pl.BlockSpec((TM, _LANES), lambda i, k: (i, 0)),
            pl.BlockSpec((TM, _LANES), lambda i, k: (i, 0)),
        ),
        scratch_shapes=[pltpu.VMEM((TM, _LANES), jnp.float32)],
        compiler_params=mm_params,
    )(a_pad, rhs, xslab)

    # --- pass 2: x_out = D^-1 A (scores * x) ---------------------------------
    xout_pad = pl.pallas_call(
        functools.partial(_aggregate_kernel, C=C),
        out_shape=jax.ShapeDtypeStruct((Np, _LANES), jnp.float32),
        grid=grid_mm,
        in_specs=[
            pl.BlockSpec((TM, TK), lambda i, k: (i, k)),
            pl.BlockSpec((TK, _LANES), lambda i, k: (k, 0)),
        ],
        out_specs=pl.BlockSpec((TM, _LANES), lambda i, k: (i, 0)),
        scratch_shapes=[pltpu.VMEM((TM, _LANES), jnp.float32)],
        compiler_params=mm_params,
    )(a_pad, gated)

    return scores_pad[:, 0], xout_pad[:, :C]


# ----------------------------------------------------------------------------
# LSPooling forward (glue: self-loops, dense adjacency, top-k, edge filtering).
# ----------------------------------------------------------------------------
class LSPoolingPallas:
    def __init__(self, in_channels: int, ratio: float = 0.5, seed: int = 0):
        self.in_channels = in_channels
        self.ratio = ratio
        # LSSMP scoring linear layer: in_channels -> 1 (deterministic glorot).
        limit = math.sqrt(6.0 / (in_channels + 1))
        self.w = jax.random.uniform(
            jax.random.PRNGKey(seed), (in_channels, 1), jnp.float32, -limit, limit
        )
        self.b = jnp.zeros((), jnp.float32)

    def __call__(self, x, edge_index, edge_attr=None, batch=None):
        N, C = x.shape
        if batch is None:
            batch = jnp.zeros((N,), jnp.int32)

        _, _, Np = _choose_tiles(N)

        # add_self_loops (PyG default fill_value=1.0 for edge_attr).
        loops = jnp.stack([jnp.arange(N), jnp.arange(N)]).astype(edge_index.dtype)
        ei_sl = jnp.concatenate([edge_index, loops], axis=1)
        # TODO(synk): LSSMP/LSCMP source was not provided; the reconstruction is
        # unweighted (edge_attr_with_selfloop is not used in the message math).

        # Dense adjacency with self loops, built directly in bf16 (0/1 exact in
        # bf16) and zero-padded to the tile grid: A[dst, src] = 1.
        # TODO(synk): for large sparse graphs this O(N^2) densification should be
        # replaced by a CSR + PrefetchScalarGridSpec gather formulation.
        a = jnp.zeros((Np, Np), jnp.bfloat16).at[ei_sl[1], ei_sl[0]].set(1.0)
        x_pad = jnp.zeros((Np, C), jnp.float32).at[:N, :].set(x.astype(jnp.float32))

        scores_full, x_mp_full = lspool_core(x_pad, self.w, self.b, a)
        scores = scores_full[:N]          # [N] f32
        x_mp = x_mp_full[:N]              # [N, C] f32

        # topk(scores, ratio, batch): top ceil(ratio * n_b) nodes per graph.
        # TODO(synk): data-dependent output sizes -> done eagerly host-side
        # (forces one host sync per layer).
        scores_np = np.asarray(scores)
        batch_np = np.asarray(batch)
        parts = []
        for bval in np.unique(batch_np):
            idx = np.nonzero(batch_np == bval)[0]
            k = int(math.ceil(self.ratio * idx.size))
            order = np.argsort(-scores_np[idx], kind="stable")[:k]
            parts.append(idx[order])
        node_index = np.concatenate(parts).astype(np.int32)

        # x = lscmp(x, scores, ei_sl)[node_index]
        x_pooled = x_mp[jnp.asarray(node_index)]

        # FilterEdges: keep edges whose endpoints are both selected; remap ids.
        new_id = -np.ones((N,), np.int32)
        new_id[node_index] = np.arange(node_index.size, dtype=np.int32)
        src = np.asarray(edge_index[0])
        dst = np.asarray(edge_index[1])
        keep = (new_id[src] >= 0) & (new_id[dst] >= 0)
        new_edge_index = jnp.asarray(
            np.stack([new_id[src[keep]], new_id[dst[keep]]]), dtype=edge_index.dtype
        )
        if edge_attr is not None:
            new_edge_attr = edge_attr[jnp.asarray(np.nonzero(keep)[0])]
        else:
            new_edge_attr = None
        new_batch = batch[jnp.asarray(node_index)]

        return (
            x_pooled,
            new_edge_index,
            new_edge_attr,
            new_batch,
            jnp.asarray(node_index),
            scores,
        )


# ----------------------------------------------------------------------------
# Demo
# ----------------------------------------------------------------------------
if __name__ == "__main__":
    N, C = 16, 8
    key = jax.random.PRNGKey(0)
    kx, ke = jax.random.split(key)
    x = jax.random.normal(kx, (N, C), jnp.float32)

    # Two disjoint 8-node rings (both directions), batch = [0]*8 + [1]*8.
    def ring_edges(offset, n):
        s = np.arange(n) + offset
        d = (np.arange(n) + 1) % n + offset
        return np.concatenate([np.stack([s, d]), np.stack([d, s])], axis=1)

    ei = np.concatenate([ring_edges(0, 8), ring_edges(8, 8)], axis=1)
    edge_index = jnp.asarray(ei, dtype=jnp.int32)                  # [2, 32]
    edge_attr = jax.random.uniform(ke, (edge_index.shape[1], 1), jnp.float32)
    batch = jnp.asarray(np.repeat([0, 1], 8), dtype=jnp.int32)

    model = LSPoolingPallas(in_channels=C, ratio=0.5)
    (x_out, new_ei, new_ea, new_batch, node_index, scores) = model(
        x, edge_index, edge_attr=edge_attr, batch=batch
    )
    jax.block_until_ready(x_out)
    jax.block_until_ready(scores)
    print("KERNEL_OK")
</pallas_src>

<mosaic_0001>
module attributes {stable_mosaic.version = 11 : i64} {
  func.func @_prep_kernel(%arg0: i32, %arg1: memref<128x128xf32, #tpu.memory_space<vmem>>, %arg2: memref<128x128xf32, #tpu.memory_space<vmem>>, %arg3: memref<128x128xbf16, #tpu.memory_space<vmem>>) attributes {dimension_semantics = [#tpu.dimension_semantics<parallel>], iteration_bounds = array<i64: 1>, scalar_prefetch = 0 : i64, scratch_operands = 0 : i64, tpu.core_type = #tpu.core_type<tc>, window_params = [{transform_indices = @transform_0, window_bounds = array<i64: 128, 128>}, {pipeline_mode = #tpu.pipeline_mode<synchronous>, transform_indices = @transform_1, window_bounds = array<i64: 128, 128>}, {transform_indices = @transform_2, window_bounds = array<i64: 128, 128>}]} {
    %c0 = arith.constant 0 : index
    %c0_0 = arith.constant 0 : index
    %0 = vector.load %arg1[%c0, %c0_0] : memref<128x128xf32, #tpu.memory_space<vmem>>, vector<128x128xf32>
    %c0_1 = arith.constant 0 : index
    %c0_2 = arith.constant 0 : index
    %1 = vector.load %arg2[%c0_1, %c0_2] : memref<128x128xf32, #tpu.memory_space<vmem>>, vector<128x128xf32>
    %cst = arith.constant dense<0.000000e+00> : vector<128x128xf32>
    %2 = tpu.matmul %0, %1, %cst {dimension_numbers = #tpu.dot_dimension_numbers<[1], [0], [0], [1], [0, 0, 1, 1], [], []>} : vector<128x128xf32>, vector<128x128xf32>, vector<128x128xf32> -> vector<128x128xf32>
    %3 = vector.extract_strided_slice %2 {offsets = [0, 0], sizes = [128, 1], strides = [1, 1]} : vector<128x128xf32> to vector<128x1xf32>
    %cst_3 = arith.constant 0.000000e+00 : f32
    %4 = vector.broadcast %cst_3 : f32 to vector<128x1xf32>
    %5 = arith.cmpf ogt, %3, %4 : vector<128x1xf32>
    %cst_4 = arith.constant 0.000000e+00 : f32
    %6 = vector.broadcast %cst_4 : f32 to vector<128x1xf32>
    %7 = arith.minimumf %3, %6 : vector<128x1xf32>
    %8 = math.exp %7 : vector<128x1xf32>
    %cst_5 = arith.constant 1.000000e+00 : f32
    %9 = vector.broadcast %cst_5 : f32 to vector<128x1xf32>
    %10 = arith.subf %8, %9 : vector<128x1xf32>
    %11 = arith.select %5, %3, %10 : vector<128x1xi1>, vector<128x1xf32>
    %12 = tpu.iota {dimensions = array<i32: 1>} : vector<128x128xi32>
    %c0_i32 = arith.constant 0 : i32
    %13 = vector.broadcast %c0_i32 : i32 to vector<128x128xi32>
    %14 = arith.cmpi eq, %12, %13 : vector<128x128xi32>
    %15 = vector.shape_cast %11 : vector<128x1xf32> to vector<128x1xf32>
    %16 = vector.broadcast %15 : vector<128x1xf32> to vector<128x128xf32>
    %17 = arith.select %14, %16, %2 : vector<128x128xi1>, vector<128x128xf32>
    %18 = arith.truncf %17 : vector<128x128xf32> to vector<128x128xbf16>
    %c0_6 = arith.constant 0 : index
    %c0_7 = arith.constant 0 : index
    %19 = vector.load %arg3[%c0_6, %c0_7] : memref<128x128xbf16, #tpu.memory_space<vmem>>, vector<128x128xbf16>
    tpu.vector_store %arg3[%c0_6, %c0_7], %18 {strides = array<i32>} : memref<128x128xbf16, #tpu.memory_space<vmem>>, vector<128x128xbf16>,
    return
  }
  func.func @transform_0(%arg0: i32) -> (i32, i32) {
    %c0_i32 = arith.constant 0 : i32
    %c0_i32_0 = arith.constant 0 : i32
    return %arg0, %c0_i32 : i32, i32
  }
  func.func @transform_1(%arg0: i32) -> (i32, i32) {
    %c0_i32 = arith.constant 0 : i32
    %c0_i32_0 = arith.constant 0 : i32
    %c0_i32_1 = arith.constant 0 : i32
    return %c0_i32, %c0_i32_0 : i32, i32
  }
  func.func @transform_2(%arg0: i32) -> (i32, i32) {
    %c0_i32 = arith.constant 0 : i32
    %c0_i32_0 = arith.constant 0 : i32
    return %arg0, %c0_i32 : i32, i32
  }
}

</mosaic_0001>

<bundles_post_ra>
// kernel: tpu_custom_call.1
= control target key start
LH: loop header
LB: loop body
LE: loop exit
PB: predicated region body
PF: predicated region fallthrough
CT: control target
= control target key end

     0   :  { %7 = vsyncpa [#allocation3], 0  ;;  %s810_s0 = inlined_call_operand.hbm [shape: f32[128,128], index: 0, kind: input, shape index: {}]   ;;  %s811_s1 = inlined_call_operand.hbm [shape: f32[128,128], index: 1, kind: input, shape index: {}]   ;;  %s812_s2 = inlined_call_operand.hbm [shape: bf16[128,128], index: 2, kind: output, shape index: {}]  }
   0x1   :  { %8 = vsyncpa [#allocation6], 0 }
   0x2   :  { %9 = vsyncpa [#allocation4], 0  ;;  %s14_s11 = sshll.u32 %s810_s0, 4  ;;  %s660_s12 = smov [#allocation2]   ;;  %s15_s11 = int_to_ptr.hbm [resolvable:$true] %s14_s11 }
   0x3   :  { %s16_s13 = sshll.u32 %s660_s12, 4  ;;  %s27_s16 = sshll.u32 %s811_s1, 4  ;;  %s17_s13 = int_to_ptr.vmem [resolvable:$true] %s16_s13  ;;  %s28_s16 = int_to_ptr.hbm [resolvable:$true] %s27_s16 }
   0x4   :  { %s661_s17 = smov 128   ;;  %s662_s18 = smov 8  }
   0x5   :  { %22 = dma.hbm_to_vmem [thread:$0]  %s15_s11, 2048, %s17_s13, [#allocation3], %s661_s17, %s661_s17, %s662_s18  }
   0x6   :  { %s663_s19 = smov [#allocation5]  }
   0x7   :  { %s29_s20 = sshll.u32 %s663_s19, 4  ;;  %s30_s20 = int_to_ptr.vmem [resolvable:$true] %s29_s20 }
   0x8   :  { %35 = dma.hbm_to_vmem [thread:$0]  %s28_s16, 2048, %s30_s20, [#allocation6], %s661_s17, %s661_s17, %s662_s18  }
   0x9   :  { %654 = dma.done.wait [#allocation3], 2048  }
   0xa   :  { %655 = vsyncadd [#allocation3], 4294965248 }
   0xb   :  { %656 = dma.done.wait [#allocation6], 2048  }
   0xc   :  { %657 = vsyncadd [#allocation6], 4294965248  ;;  %v75_v0 = vld [vmem:[#allocation5 + $0x78] sm:$0xff]  ;;  %v74_v1 = vld [vmem:[#allocation5 + $0x70] sm:$0xff]  ;;  %v664_v32 = vmov 0   ;;  %s665_s0 = smov [#allocation7]  }
   0xd   :  { %76 = vmatpush.msra.mxu0 %v75_v0  ;;  %451 = vmatpush.msra.mxu1 %v75_v0  ;;  %v73_v2 = vld [vmem:[#allocation5 + $0x68] sm:$0xff]  ;;  %v72_v3 = vld [vmem:[#allocation5 + $0x60] sm:$0xff]  ;;  %v71_v4 = vld [vmem:[#allocation5 + $0x58] sm:$0xff]  ;;  %s372_s1 = sshll.u32 %s665_s0, 4  ;;  %s374_s23 = sshll.u32 %s812_s2, 4  ;;  %s373_s1 = int_to_ptr.vmem [resolvable:$true] %s372_s1  ;;  %s375_s23 = int_to_ptr.hbm [resolvable:$true] %s374_s23 }
   0xe   :  { %452 = vmatpush.msra.mxu2 %v75_v0  ;;  %453 = vmatpush.msra.mxu3 %v75_v0  ;;  %v70_v5 = vld [vmem:[#allocation5 + $0x50] sm:$0xff]  ;;  %v69_v6 = vld [vmem:[#allocation5 + $0x48] sm:$0xff]  ;;  %v68_v7 = vld [vmem:[#allocation5 + $0x40] sm:$0xff]  ;;  %s666_s2 = smov 64   ;;  %s667_s24 = smov 4  }
   0xf   :  { %77 = vmatpush.msra.mxu0 %v74_v1  ;;  %454 = vmatpush.msra.mxu1 %v74_v1  ;;  %v67_v8 = vld [vmem:[#allocation5 + $0x38] sm:$0xff]  ;;  %v66_v9 = vld [vmem:[#allocation5 + $0x30] sm:$0xff]  ;;  %v65_v10 = vld [vmem:[#allocation5 + $0x28] sm:$0xff] }
  0x10   :  { %455 = vmatpush.msra.mxu2 %v74_v1  ;;  %456 = vmatpush.msra.mxu3 %v74_v1  ;;  %v64_v11 = vld [vmem:[#allocation5 + $0x20] sm:$0xff]  ;;  %v63_v12 = vld [vmem:[#allocation5 + $0x18] sm:$0xff]  ;;  %v62_v13 = vld [vmem:[#allocation5 + $0x10] sm:$0xff] }
  0x11   :  { %78 = vmatpush.msra.mxu0 %v73_v2  ;;  %457 = vmatpush.msra.mxu1 %v73_v2  ;;  %v61_v14 = vld [vmem:[#allocation5 + $0x8] sm:$0xff]  ;;  %v60_v15 = vld [vmem:[#allocation5] sm:$0xff]  ;;  %v46_v24 = vld [vmem:[#allocation2 + $0x10] sm:$0xff] }
  0x12   :  { %458 = vmatpush.msra.mxu2 %v73_v2  ;;  %459 = vmatpush.msra.mxu3 %v73_v2  ;;  %v44_v16 = vld [vmem:[#allocation2] sm:$0xff]  ;;  %v45_v20 = vld [vmem:[#allocation2 + $0x8] sm:$0xff]  ;;  %v50_v25 = vld [vmem:[#allocation2 + $0x30] sm:$0xff] }
  0x13   :  { %79 = vmatpush.msra.mxu0 %v72_v3  ;;  %460 = vmatpush.msra.mxu1 %v72_v3  ;;  %v48_v17 = vld [vmem:[#allocation2 + $0x20] sm:$0xff]  ;;  %v49_v21 = vld [vmem:[#allocation2 + $0x28] sm:$0xff]  ;;  %v54_v26 = vld [vmem:[#allocation2 + $0x50] sm:$0xff] }
  0x14   :  { %461 = vmatpush.msra.mxu2 %v72_v3  ;;  %462 = vmatpush.msra.mxu3 %v72_v3  ;;  %v52_v18 = vld [vmem:[#allocation2 + $0x40] sm:$0xff]  ;;  %v53_v22 = vld [vmem:[#allocation2 + $0x48] sm:$0xff]  ;;  %v58_v27 = vld [vmem:[#allocation2 + $0x70] sm:$0xff] }
  0x15   :  { %80 = vmatpush.msra.mxu0 %v71_v4  ;;  %463 = vmatpush.msra.mxu1 %v71_v4  ;;  %v56_v19 = vld [vmem:[#allocation2 + $0x60] sm:$0xff]  ;;  %v57_v23 = vld [vmem:[#allocation2 + $0x68] sm:$0xff]  ;;  %v47_v28 = vld [vmem:[#allocation2 + $0x18] sm:$0xff] }
  0x16   :  { %464 = vmatpush.msra.mxu2 %v71_v4  ;;  %465 = vmatpush.msra.mxu3 %v71_v4  ;;  %v51_v29 = vld [vmem:[#allocation2 + $0x38] sm:$0xff] }
  0x17   :  { %81 = vmatpush.msra.mxu0 %v70_v5  ;;  %466 = vmatpush.msra.mxu1 %v70_v5  ;;  %v55_v30 = vld [vmem:[#allocation2 + $0x58] sm:$0xff] }
  0x18   :  { %467 = vmatpush.msra.mxu2 %v70_v5  ;;  %468 = vmatpush.msra.mxu3 %v70_v5  ;;  %v59_v31 = vld [vmem:[#allocation2 + $0x78] sm:$0xff] }
  0x19   :  { %82 = vmatpush.msra.mxu0 %v69_v6  ;;  %469 = vmatpush.msra.mxu1 %v69_v6 }
  0x1a   :  { %470 = vmatpush.msra.mxu2 %v69_v6  ;;  %471 = vmatpush.msra.mxu3 %v69_v6 }
  0x1b   :  { %83 = vmatpush.msra.mxu0 %v68_v7  ;;  %472 = vmatpush.msra.mxu1 %v68_v7 }
  0x1c   :  { %473 = vmatpush.msra.mxu2 %v68_v7  ;;  %474 = vmatpush.msra.mxu3 %v68_v7 }
  0x1d   :  { %84 = vmatpush.msra.mxu0 %v67_v8  ;;  %475 = vmatpush.msra.mxu1 %v67_v8 }
  0x1e   :  { %476 = vmatpush.msra.mxu2 %v67_v8  ;;  %477 = vmatpush.msra.mxu3 %v67_v8 }
  0x1f   :  { %85 = vmatpush.msra.mxu0 %v66_v9  ;;  %478 = vmatpush.msra.mxu1 %v66_v9 }
  0x20   :  { %479 = vmatpush.msra.mxu2 %v66_v9  ;;  %480 = vmatpush.msra.mxu3 %v66_v9 }
  0x21   :  { %86 = vmatpush.msra.mxu0 %v65_v10  ;;  %481 = vmatpush.msra.mxu1 %v65_v10 }
  0x22   :  { %482 = vmatpush.msra.mxu2 %v65_v10  ;;  %483 = vmatpush.msra.mxu3 %v65_v10 }
  0x23   :  { %87 = vmatpush.msra.mxu0 %v64_v11  ;;  %484 = vmatpush.msra.mxu1 %v64_v11 }
  0x24   :  { %485 = vmatpush.msra.mxu2 %v64_v11  ;;  %486 = vmatpush.msra.mxu3 %v64_v11 }
  0x25   :  { %88 = vmatpush.msra.mxu0 %v63_v12  ;;  %487 = vmatpush.msra.mxu1 %v63_v12 }
  0x26   :  { %488 = vmatpush.msra.mxu2 %v63_v12  ;;  %489 = vmatpush.msra.mxu3 %v63_v12 }
  0x27   :  { %89 = vmatpush.msra.mxu0 %v62_v13  ;;  %490 = vmatpush.msra.mxu1 %v62_v13 }
  0x28   :  { %491 = vmatpush.msra.mxu2 %v62_v13  ;;  %492 = vmatpush.msra.mxu3 %v62_v13 }
  0x29   :  { %90 = vmatpush.msra.mxu0 %v61_v14  ;;  %493 = vmatpush.msra.mxu1 %v61_v14 }
  0x2a   :  { %494 = vmatpush.msra.mxu2 %v61_v14  ;;  %495 = vmatpush.msra.mxu3 %v61_v14 }
  0x2b   :  { %91 = vmatpush.msra.mxu0 %v60_v15  ;;  %496 = vmatpush.msra.mxu1 %v60_v15 }
  0x2c   :  { %497 = vmatpush.msra.mxu2 %v60_v15  ;;  %498 = vmatpush.msra.mxu3 %v60_v15 }
  0x2d   :  { %92 = vmatmul.f32.vlgmr.msra.gmra.mxu0 %v44_v16  ;;  %104 = vmatmul.f32.vlgmr.msra.gmra.mxu1 %v48_v17 }
  0x2e   :  { %116 = vmatmul.f32.vlgmr.msra.gmra.mxu2 %v52_v18  ;;  %128 = vmatmul.f32.vlgmr.msra.gmra.mxu3 %v56_v19 }
  0x2f   :  { %513 = vset.pattern.permute.xlu1 %v664_v32  ;;  %507 = vset.pattern.permute.xlu0 %v664_v32 }
  0x30   :  { %519 = vset.pattern.permute.xlu2 %v664_v32 }
  0x35   :  { %95 = vmatmul.f32.gmra.mxu0 %v45_v20  ;;  %107 = vmatmul.f32.gmra.mxu1 %v49_v21 }
  0x36   :  { %119 = vmatmul.f32.gmra.mxu2 %v53_v22  ;;  %131 = vmatmul.f32.gmra.mxu3 %v57_v23 }
  0x3d   :  { %98 = vmatmul.f32.gmra.mxu0 %v46_v24  ;;  %110 = vmatmul.f32.gmra.mxu1 %v50_v25 }
  0x3e   :  { %122 = vmatmul.f32.gmra.mxu2 %v54_v26  ;;  %134 = vmatmul.f32.gmra.mxu3 %v58_v27 }
  0x45   :  { %101 = vmatmul.f32.gmra.mxu0 %v47_v28  ;;  %113 = vmatmul.f32.gmra.mxu1 %v51_v29 }
  0x46   :  { %125 = vmatmul.f32.gmra.mxu2 %v55_v30  ;;  %137 = vmatmul.f32.gmra.mxu3 %v59_v31 }
  0xaa   :  { %v689_v33 = vpop.f32.mrf.mxu0  ;;  %v691_v34 = vpop.f32.mrf.mxu1 }
  0xab   :  { %v157_v35 = vmin.f32 %v689_v33, 0.0  ;;  %v161_v36 = vmin.f32 %v691_v34, 0.0  ;;  %vm145_vm0 = vcmp.gt.f32.partialorder %v691_v34, 0.0  ;;  %vm141_vm1 = vcmp.gt.f32.partialorder %v689_v33, 0.0 }
  0xad   :  { %v173_v37 = vmul.f32 1.442695, %v157_v35  ;;  %v181_v38 = vmul.f32 1.442695, %v161_v36 }
  0xaf   :  { %550 = vpow2.f32 %v173_v37 }
  0xb0   :  { %552 = vpow2.f32 %v181_v38 }
  0xb1   :  { %v695_v39 = vpop.f32.mrf.mxu2  ;;  %v697_v40 = vpop.f32.mrf.mxu3 }
  0xb2   :  { %v165_v41 = vmin.f32 %v695_v39, 0.0  ;;  %v700_v42 = vpop.f32.mrf.mxu0  ;;  %v702_v43 = vpop.f32.mrf.mxu1  ;;  %v169_v4 = vmin.f32 %v697_v40, 0.0  ;;  %vm149_vm3 = vcmp.gt.f32.partialorder %v695_v39, 0.0  ;;  %vm153_vm14 = vcmp.gt.f32.partialorder %v697_v40, 0.0 }
  0xb3   :  { %v158_v44 = vmin.f32 %v700_v42, 0.0  ;;  %v162_v45 = vmin.f32 %v702_v43, 0.0  ;;  %vm142_vm2 = vcmp.gt.f32.partialorder %v700_v42, 0.0  ;;  %vm146_vm4 = vcmp.gt.f32.partialorder %v702_v43, 0.0 }
  0xb4   :  { %v189_v46 = vmul.f32 1.442695, %v165_v41  ;;  %v197_v30 = vmul.f32 1.442695, %v169_v4 }
  0xb5   :  { %v175_v47 = vmul.f32 1.442695, %v158_v44  ;;  %v183_v48 = vmul.f32 1.442695, %v162_v45  ;;  %v551_v49 = vpop.eup %550 }
  0xb6   :  { %554 = vpow2.f32 %v189_v46  ;;  %v553_v52 = vpop.eup %552  ;;  %v388_v61 = vadd.f32 -1.0, %v551_v49 }
  0xb7   :  { %556 = vpow2.f32 %v175_v47  ;;  %v392_v60 = vadd.f32 -1.0, %v553_v52 }
  0xb8   :  { %558 = vpow2.f32 %v183_v48  ;;  %v221_v9 = vsel %vm141_vm1, %v689_v33, %v388_v61 }
  0xb9   :  { %v706_v50 = vpop.f32.mrf.mxu2  ;;  %v708_v51 = vpop.f32.mrf.mxu3  ;;  %v225_v8 = vsel %vm145_vm0, %v691_v34, %v392_v60 }
  0xba   :  { %v166_v53 = vmin.f32 %v706_v50, 0.0  ;;  %v711_v54 = vpop.f32.mrf.mxu0  ;;  %v713_v55 = vpop.f32.mrf.mxu1  ;;  %v170_v11 = vmin.f32 %v708_v51, 0.0  ;;  %vm150_vm5 = vcmp.gt.f32.partialorder %v706_v50, 0.0  ;;  %vm154_vm12 = vcmp.gt.f32.partialorder %v708_v51, 0.0 }
  0xbb   :  { %v159_v56 = vmin.f32 %v711_v54, 0.0  ;;  %v163_v57 = vmin.f32 %v713_v55, 0.0  ;;  %vm143_vm6 = vcmp.gt.f32.partialorder %v711_v54, 0.0  ;;  %vm147_vm7 = vcmp.gt.f32.partialorder %v713_v55, 0.0 }
  0xbc   :  { %v555_v58 = vpop.eup %554  ;;  %v191_v59 = vmul.f32 1.442695, %v166_v53  ;;  %v199_v27 = vmul.f32 1.442695, %v170_v11 }
  0xbd   :  { %v557_v62 = vpop.eup %556  ;;  %v177_v63 = vmul.f32 1.442695, %v159_v56  ;;  %v185_v1 = vmul.f32 1.442695, %v163_v57  ;;  %v396_v3 = vadd.f32 -1.0, %v555_v58 }
  0xbe   :  { %560 = vpow2.f32 %v191_v59  ;;  %v559_v0 = vpop.eup %558  ;;  %v389_v2 = vadd.f32 -1.0, %v557_v62 }
  0xbf   :  { %v393_v5 = vadd.f32 -1.0, %v559_v0  ;;  %562 = vpow2.f32 %v177_v63  ;;  %v229_v17 = vsel %vm149_vm3, %v695_v39, %v396_v3 }
  0xc0   :  { %v222_v10 = vsel %vm142_vm2, %v700_v42, %v389_v2  ;;  %564 = vpow2.f32 %v185_v1 }
  0xc1   :  { %v722_v6 = vpop.f32.mrf.mxu2  ;;  %v724_v7 = vpop.f32.mrf.mxu3  ;;  %v226_v21 = vsel %vm146_vm4, %v702_v43, %v393_v5  ;;  %v508_v22 = vpack.i.bf16 %v222_v10, %v221_v9 }
  0xc2   :  { %v167_v12 = vmin.f32 %v722_v6, 0.0  ;;  %v732_v13 = vpop.f32.mrf.mxu0  ;;  %v734_v14 = vpop.f32.mrf.mxu1  ;;  %v171_v20 = vmin.f32 %v724_v7, 0.0  ;;  %v514_v25 = vpack.i.bf16 %v226_v21, %v225_v8  ;;  %vm151_vm10 = vcmp.gt.f32.partialorder %v722_v6, 0.0 }
  0xc3   :  { %v160_v15 = vmin.f32 %v732_v13, 0.0  ;;  %v164_v16 = vmin.f32 %v734_v14, 0.0  ;;  %509 = vperm.xlu0 %507, %v508_v22   ;;  %vm144_vm8 = vcmp.gt.f32.partialorder %v732_v13, 0.0  ;;  %vm148_vm9 = vcmp.gt.f32.partialorder %v734_v14, 0.0 }
  0xc4   :  { %v561_v18 = vpop.eup %560  ;;  %v193_v19 = vmul.f32 1.442695, %v167_v12  ;;  %515 = vperm.xlu1 %513, %v514_v25   ;;  %v201_v35 = vmul.f32 1.442695, %v171_v20  ;;  %vm155_vm15 = vcmp.gt.f32.partialorder %v724_v7, 0.0 }
  0xc5   :  { %v179_v23 = vmul.f32 1.442695, %v160_v15  ;;  %v187_v24 = vmul.f32 1.442695, %v164_v16  ;;  %v397_v26 = vadd.f32 -1.0, %v561_v18  ;;  %v563_v29 = vpop.eup %562 }
  0xc6   :  { %566 = vpow2.f32 %v193_v19  ;;  %v565_v32 = vpop.eup %564  ;;  %v390_v47 = vadd.f32 -1.0, %v563_v29 }
  0xc7   :  { %v230_v28 = vsel %vm150_vm5, %v706_v50, %v397_v26  ;;  %568 = vpow2.f32 %v179_v23  ;;  %v394_v49 = vadd.f32 -1.0, %v565_v32  ;;  %v237_v23 = vlaneseq }
  0xc8   :  { %v520_v31 = vpack.i.bf16 %v230_v28, %v229_v17  ;;  %570 = vpow2.f32 %v187_v24  ;;  %v223_v60 = vsel %vm143_vm6, %v711_v54, %v390_v47 }
  0xc9   :  { %v749_v36 = vpop.f32.mrf.mxu2  ;;  %v751_v37 = vpop.f32.mrf.mxu3  ;;  %572 = vpow2.f32 %v199_v27  ;;  %v227_v63 = vsel %vm147_vm7, %v713_v55, %v394_v49  ;;  %v238_v24 = vand.u32 127, %v237_v23 }
  0xca   :  { %v168_v38 = vmin.f32 %v749_v36, 0.0  ;;  %v172_v41 = vmin.f32 %v751_v37, 0.0  ;;  %521 = vperm.xlu2 %519, %v520_v31   ;;  %574 = vpow2.f32 %v197_v30  ;;  %vm152_vm11 = vcmp.gt.f32.partialorder %v749_v36, 0.0 }
  0xcb   :  { %576 = vpow2.f32 %v201_v35  ;;  %vm156_vm13 = vcmp.gt.f32.partialorder %v751_v37, 0.0  ;;  %vm239_vm0 = vcmp.eq.s32.totalorder %v238_v24, 0 }
  0xcc   :  { %v195_v44 = vmul.f32 1.442695, %v168_v38  ;;  %v203_v45 = vmul.f32 1.442695, %v172_v41  ;;  %v567_v46 = vpop.eup %566 }
  0xcd   :  { %v569_v48 = vpop.eup %568  ;;  %v398_v58 = vadd.f32 -1.0, %v567_v46 }
  0xce   :  { %578 = vpow2.f32 %v195_v44  ;;  %v571_v52 = vpop.eup %570  ;;  %v391_v53 = vadd.f32 -1.0, %v569_v48 }
  0xcf   :  { %580 = vpow2.f32 %v203_v45  ;;  %v573_v56 = vpop.eup %572  ;;  %v395_v57 = vadd.f32 -1.0, %v571_v52  ;;  %v231_v10 = vsel %vm151_vm10, %v722_v6, %v398_v58 }
  0xd0   :  { %v224_v59 = vsel %vm144_vm8, %v732_v13, %v391_v53  ;;  %v575_v61 = vpop.eup %574  ;;  %v401_v2 = vadd.f32 -1.0, %v573_v56 }
  0xd1   :  { %v228_v62 = vsel %vm148_vm9, %v734_v14, %v395_v57  ;;  %v525_v0 = vpack.i.bf16 %v224_v59, %v223_v60  ;;  %v577_v1 = vpop.eup %576  ;;  %v400_v8 = vadd.f32 -1.0, %v575_v61 }
  0xd2   :  { %v530_v3 = vpack.i.bf16 %v228_v62, %v227_v63  ;;  %v402_v11 = vadd.f32 -1.0, %v577_v1  ;;  %v234_v16 = vsel %vm154_vm12, %v708_v51, %v401_v2 }
  0xd3   :  { %526 = vperm.xlu0 %507, %v525_v0   ;;  %v233_v19 = vsel %vm153_vm14, %v697_v40, %v400_v8 }
  0xd4   :  { %v579_v4 = vpop.eup %578  ;;  %531 = vperm.xlu1 %513, %v530_v3   ;;  %v235_v20 = vsel %vm155_vm15, %v724_v7, %v402_v11  ;;  %v540_v21 = vpack.i.bf16 %v234_v16, %v233_v19 }
  0xd5   :  { %v581_v5 = vpop.eup %580  ;;  %v399_v9 = vadd.f32 -1.0, %v579_v4 }
  0xd6   :  { %v403_v12 = vadd.f32 -1.0, %v581_v5 }
  0xd7   :  { %v232_v15 = vsel %vm152_vm11, %v749_v36, %v399_v9 }
  0xd8   :  { %v236_v17 = vsel %vm156_vm13, %v751_v37, %v403_v12  ;;  %v535_v18 = vpack.i.bf16 %v232_v15, %v231_v10 }
  0xd9   :  { %v545_v22 = vpack.i.bf16 %v236_v17, %v235_v20 }
  0xda   :  { %536 = vperm.xlu2 %519, %v535_v18  }
  0xdb   :  { %541 = vperm.xlu0 %507, %v540_v21  }
  0xdc   :  { %546 = vperm.xlu1 %513, %v545_v22  }
 0x124   :  { %v522_v25 = vpop.permute.xlu2 %521 }
 0x125   :  { %v524_v26 = vunpack.i.h.bf16 %v522_v25  ;;  %v523_v27 = vunpack.i.l.bf16 %v522_v25 }
 0x127   :  { %v329_v28 = vsel %vm239_vm0, %v524_v26, %v706_v50  ;;  %v328_v29 = vsel %vm239_vm0, %v523_v27, %v695_v39 }
 0x128   :  { %v427_v30 = vpack.c.bf16 %v329_v28, %v328_v29 }
 0x12a   :  { %447 = vst [vmem:[#allocation7 + $0x20] sm:$0xff] %v427_v30  }
 0x134   :  { %v537_v31 = vpop.permute.xlu2 %536 }
 0x135   :  { %v539_v32 = vunpack.i.h.bf16 %v537_v31  ;;  %v538_v35 = vunpack.i.l.bf16 %v537_v31  ;;  %v510_v45 = vpop.permute.xlu0 %509 }
 0x136   :  { %v516_v46 = vpop.permute.xlu1 %515  ;;  %v512_v47 = vunpack.i.h.bf16 %v510_v45  ;;  %v511_v48 = vunpack.i.l.bf16 %v510_v45 }
 0x137   :  { %v331_v38 = vsel %vm239_vm0, %v539_v32, %v749_v36  ;;  %v330_v41 = vsel %vm239_vm0, %v538_v35, %v722_v6  ;;  %v518_v50 = vunpack.i.h.bf16 %v516_v46  ;;  %v517_v49 = vunpack.i.l.bf16 %v516_v46 }
 0x138   :  { %v432_v44 = vpack.c.bf16 %v331_v38, %v330_v41  ;;  %v321_v39 = vsel %vm239_vm0, %v512_v47, %v700_v42  ;;  %v320_v52 = vsel %vm239_vm0, %v511_v48, %v689_v33 }
 0x139   :  { %v325_v36 = vsel %vm239_vm0, %v518_v50, %v702_v43  ;;  %v324_v6 = vsel %vm239_vm0, %v517_v49, %v691_v34  ;;  %v407_v53 = vpack.c.bf16 %v321_v39, %v320_v52 }
 0x13a   :  { %448 = vst [vmem:[#allocation7 + $0x28] sm:$0xff] %v432_v44   ;;  %v417_v56 = vpack.c.bf16 %v325_v36, %v324_v6 }
 0x13b   :  { %408 = vst [vmem:[#allocation7] sm:$0xff] %v407_v53  }
 0x13c   :  { %445 = vst [vmem:[#allocation7 + $0x10] sm:$0xff] %v417_v56  }
 0x145   :  { %v527_v57 = vpop.permute.xlu0 %526 }
 0x146   :  { %v532_v58 = vpop.permute.xlu1 %531  ;;  %v529_v59 = vunpack.i.h.bf16 %v527_v57  ;;  %v528_v60 = vunpack.i.l.bf16 %v527_v57 }
 0x147   :  { %v534_v61 = vunpack.i.h.bf16 %v532_v58  ;;  %v533_v62 = vunpack.i.l.bf16 %v532_v58 }
 0x148   :  { %v323_v42 = vsel %vm239_vm0, %v529_v59, %v732_v13  ;;  %v322_v33 = vsel %vm239_vm0, %v528_v60, %v711_v54 }
 0x149   :  { %v327_v43 = vsel %vm239_vm0, %v534_v61, %v734_v14  ;;  %v326_v34 = vsel %vm239_vm0, %v533_v62, %v713_v55  ;;  %v412_v63 = vpack.c.bf16 %v323_v42, %v322_v33 }
 0x14a   :  { %v422_v0 = vpack.c.bf16 %v327_v43, %v326_v34 }
 0x14b   :  { %444 = vst [vmem:[#allocation7 + $0x8] sm:$0xff] %v412_v63  }
 0x14c   :  { %446 = vst [vmem:[#allocation7 + $0x18] sm:$0xff] %v422_v0  }
 0x14d   :  { %v542_v1 = vpop.permute.xlu0 %541 }
 0x14e   :  { %v547_v2 = vpop.permute.xlu1 %546  ;;  %v544_v3 = vunpack.i.h.bf16 %v542_v1  ;;  %v543_v4 = vunpack.i.l.bf16 %v542_v1 }
 0x14f   :  { %v549_v54 = vunpack.i.h.bf16 %v547_v2  ;;  %v548_v13 = vunpack.i.l.bf16 %v547_v2 }
 0x150   :  { %v333_v14 = vsel %vm239_vm0, %v544_v3, %v708_v51  ;;  %v332_v55 = vsel %vm239_vm0, %v543_v4, %v697_v40 }
 0x151   :  { %v335_v5 = vsel %vm239_vm0, %v549_v54, %v751_v37  ;;  %v334_v8 = vsel %vm239_vm0, %v548_v13, %v724_v7  ;;  %v437_v9 = vpack.c.bf16 %v333_v14, %v332_v55 }
 0x152   :  { %v442_v10 = vpack.c.bf16 %v335_v5, %v334_v8 }
 0x153   :  { %449 = vst [vmem:[#allocation7 + $0x30] sm:$0xff] %v437_v9  }
 0x154   :  { %450 = vst [vmem:[#allocation7 + $0x38] sm:$0xff] %v442_v10  }
 0x155   :  { %380 = dma.vmem_to_hbm [thread:$0]  %s373_s1, 1024, %s375_s23, [#allocation4], %s666_s2, %s666_s2, %s667_s24  }
 0x156   :  { %658 = dma.done.wait [#allocation4], 1024  }
 0x157   :  { %659 = vsyncadd [#allocation4], 4294966272 }
 0x158   :  { %385 = vsyncpa [#allocation3], 1 }
 0x159   :  { %386 = vsyncpa [#allocation6], 1 }
 0x15a   :  { %387 = vsyncpa [#allocation4], 1 }

</bundles_post_ra>
